<compile_context>
chip_gen: v6e
topology: v6e:2x2x1
jax: 0.10.0
libtpu: 0.0.40
codegen_flags: <defaults>
</compile_context>

<pallas_src>
import functools

import jax
import jax.numpy as jnp
from jax.experimental import pallas as pl
from jax.experimental.pallas import tpu as pltpu


LANES = 128           # lane-dense packing / output width
NEG_INF = -1e30       # bias for padded logit columns (f32 exp underflows to 0)


def _round_up(v, m):
    return ((v + m - 1) // m) * m


def gcn_classifier_kernel(g_ref, w_ref, b_ref, out_ref,
                          *, np_rows, f, hidden, r_w2, r_wf):
    """One graph per grid step: g_ref holds [Â ; X] row-stacked, bf16."""
    g = g_ref[0]                                   # (2*NP, 128) bf16, full-tile load
    a = g[0:np_rows, 0:np_rows]                    # (NP, NP)  normalized adjacency
    x = g[np_rows:2 * np_rows, 0:f]                # (NP, F)   node features

    # Packed parameters (16-row-aligned offsets; bias tile read whole).
    w1 = w_ref[0:f, 0:hidden]                      # (F, H)    bf16
    w2 = w_ref[r_w2:r_w2 + hidden, 0:hidden]       # (H, H)    bf16
    wf = w_ref[r_wf:r_wf + hidden, :]              # (H, 128)  bf16 (cols >= C are 0)
    b_all = b_ref[...]                             # (8, 128)  f32, one full-tile load
    b1 = b_all[0:1, 0:hidden]                      # (1, H)
    b2 = b_all[1:2, 0:hidden]                      # (1, H)
    bfc = b_all[2:3, :]                            # (1, 128)  cols >= C are -1e30

    # --- GCNConv 1 (reassociated): (Â @ X) @ W1 + b1, ReLU ---
    ax = jnp.dot(a, x, preferred_element_type=jnp.float32)               # (NP, F)
    h1 = jnp.dot(ax.astype(jnp.bfloat16), w1,
                 preferred_element_type=jnp.float32) + b1                # (NP, H)
    h1 = jnp.maximum(h1, 0.0)
    # dropout(p=0.5, training=False) -> identity in eval mode.

    # --- GCNConv 2: Â @ (h1 @ W2) + b2, ReLU ---
    xw2 = jnp.dot(h1.astype(jnp.bfloat16), w2,
                  preferred_element_type=jnp.float32)                    # (NP, H)
    h2 = jnp.dot(a, xw2.astype(jnp.bfloat16),
                 preferred_element_type=jnp.float32) + b2                # (NP, H)
    h2 = jnp.maximum(h2, 0.0)

    # --- Final Linear (padded to 128 classes) + log_softmax over classes ---
    logits = jnp.dot(h2.astype(jnp.bfloat16), wf,
                     preferred_element_type=jnp.float32) + bfc           # (NP, 128)
    m = jnp.max(logits, axis=1, keepdims=True)     # padded cols (-1e30) never win
    z = logits - m
    denom = jnp.sum(jnp.exp(z), axis=1, keepdims=True)   # exp(padded) == 0 exactly
    out_ref[0] = z - jnp.log(denom)                # lane-dense (NP, 128) store


# ----------------------------------------------------------------------------
# Load-time packing (hoisted out of the per-call forward path).
# ----------------------------------------------------------------------------

def pack_params(w1, b1, w2, b2, wf, bf):
    """Model-load-time packing: one bf16 weight pack + one f32 bias pack."""
    f, hidden = w1.shape
    num_classes = wf.shape[1]
    assert hidden <= LANES and num_classes <= LANES, "packing assumes H, C <= 128"

    r_w2 = _round_up(f, 16)
    r_wf = r_w2 + _round_up(hidden, 16)
    rows = r_wf + _round_up(hidden, 16)
    w_pack = jnp.zeros((rows, LANES), jnp.bfloat16)
    w_pack = w_pack.at[:f, :hidden].set(w1.astype(jnp.bfloat16))
    w_pack = w_pack.at[r_w2:r_w2 + hidden, :hidden].set(w2.astype(jnp.bfloat16))
    w_pack = w_pack.at[r_wf:r_wf + hidden, :num_classes].set(wf.astype(jnp.bfloat16))

    b_pack = jnp.zeros((8, LANES), jnp.float32)
    b_pack = b_pack.at[0, :hidden].set(b1.reshape(-1).astype(jnp.float32))
    b_pack = b_pack.at[1, :hidden].set(b2.reshape(-1).astype(jnp.float32))
    bf_row = jnp.full((LANES,), NEG_INF, jnp.float32)
    bf_row = bf_row.at[:num_classes].set(bf.reshape(-1).astype(jnp.float32))
    b_pack = b_pack.at[2, :].set(bf_row)
    return w_pack, b_pack


def pack_graphs(a_hat, x):
    """Graph-load-time packing: row-stack [Â ; X] per graph into one bf16 block."""
    batch, n, _ = a_hat.shape
    f = x.shape[-1]
    np_rows = _round_up(n, 16)
    g_pack = jnp.zeros((batch, 2 * np_rows, LANES), jnp.bfloat16)
    g_pack = g_pack.at[:, :n, :n].set(a_hat.astype(jnp.bfloat16))
    g_pack = g_pack.at[:, np_rows:np_rows + n, :f].set(x.astype(jnp.bfloat16))
    return g_pack


def make_gcn_forward(*, num_nodes, num_features, hidden_dim, num_classes):
    """Build the jitted forward over pre-packed buffers."""
    np_rows = _round_up(num_nodes, 16)
    r_w2 = _round_up(num_features, 16)
    r_wf = r_w2 + _round_up(hidden_dim, 16)
    w_rows = r_wf + _round_up(hidden_dim, 16)

    kernel = functools.partial(
        gcn_classifier_kernel, np_rows=np_rows, f=num_features,
        hidden=hidden_dim, r_w2=r_w2, r_wf=r_wf)

    @jax.jit
    def forward(g_pack, w_pack, b_pack):
        batch = g_pack.shape[0]
        out = pl.pallas_call(
            kernel,
            out_shape=jax.ShapeDtypeStruct((batch, np_rows, LANES), jnp.float32),
            grid=(batch,),
            in_specs=[
                # per-graph [Â ; X] block -> new DMA every grid step
                pl.BlockSpec((1, 2 * np_rows, LANES), lambda b: (b, 0, 0)),
                # constant block index -> DMA'd once, elided on later steps
                pl.BlockSpec((w_rows, LANES), lambda b: (0, 0)),
                pl.BlockSpec((8, LANES), lambda b: (0, 0)),
            ],
            out_specs=pl.BlockSpec((1, np_rows, LANES), lambda b: (b, 0, 0)),
            compiler_params=pltpu.CompilerParams(
                dimension_semantics=("parallel",)),   # 2x on v7x dual-TC
        )(g_pack, w_pack, b_pack)
        # Only columns < num_classes are valid (padded lanes hold ~-1e30).
        return out[:, :num_nodes, :num_classes]

    return forward


# ----------------------------------------------------------------------------
# Plain-JAX glue (graph normalization, init) and example run.
# ----------------------------------------------------------------------------

def build_normalized_adjacency(edge_index, num_nodes):
    """Â = D^{-1/2} (A + I) D^{-1/2}, messages flow src -> dst (rows = dst)."""
    src, dst = edge_index[0], edge_index[1]
    adj = jnp.zeros((num_nodes, num_nodes), jnp.float32).at[dst, src].set(1.0)
    adj = adj + jnp.eye(num_nodes, dtype=jnp.float32)        # add self-loops
    deg = jnp.sum(adj, axis=1)
    d_inv_sqrt = 1.0 / jnp.sqrt(deg)
    return adj * d_inv_sqrt[:, None] * d_inv_sqrt[None, :]


def glorot(key, shape):
    fan_in, fan_out = shape
    limit = jnp.sqrt(6.0 / (fan_in + fan_out))
    return jax.random.uniform(key, shape, jnp.float32, -limit, limit)


if __name__ == "__main__":
    num_nodes = 16
    num_features = 8
    hidden_dim = 32
    num_classes = 4
    batch = 4            # batch of graphs to amortize launch / DMA overhead

    key = jax.random.PRNGKey(0)
    k_x, k_w1, k_w2, k_wf, k_bf = jax.random.split(key, 5)

    # Node features per graph: (B, N, F)
    x = jax.random.normal(k_x, (batch, num_nodes, num_features), jnp.float32)

    # Synthetic graph: bidirectional ring over 16 nodes, edge_index shape (2, 2N).
    idx = jnp.arange(num_nodes)
    src = jnp.concatenate([idx, (idx + 1) % num_nodes])
    dst = jnp.concatenate([(idx + 1) % num_nodes, idx])
    edge_index = jnp.stack([src, dst])

    a_hat = build_normalized_adjacency(edge_index, num_nodes)      # (N, N)
    a_hat_b = jnp.broadcast_to(a_hat, (batch, num_nodes, num_nodes))

    # Deterministic parameter init (shapes per module __init__).
    w1 = glorot(k_w1, (num_features, hidden_dim))
    b1 = jnp.zeros((1, hidden_dim), jnp.float32)
    w2 = glorot(k_w2, (hidden_dim, hidden_dim))
    b2 = jnp.zeros((1, hidden_dim), jnp.float32)
    wf = glorot(k_wf, (hidden_dim, num_classes))
    bf = jax.random.uniform(k_bf, (1, num_classes), jnp.float32,
                            -1.0 / jnp.sqrt(hidden_dim), 1.0 / jnp.sqrt(hidden_dim))

    # One-time packing (model / graph load time) — hoisted out of forward.
    w_pack, b_pack = pack_params(w1, b1, w2, b2, wf, bf)
    g_pack = pack_graphs(a_hat_b, x)

    forward = make_gcn_forward(num_nodes=num_nodes, num_features=num_features,
                               hidden_dim=hidden_dim, num_classes=num_classes)

    out = forward(g_pack, w_pack, b_pack)
    out = jax.block_until_ready(out)

    # Pure-JAX f32 reference (tolerance-checked: MXU operands are bf16-rounded).
    def reference_forward(a, xg):
        h = jnp.maximum(a @ (xg @ w1) + b1, 0.0)
        h = jnp.maximum(a @ (h @ w2) + b2, 0.0)
        logits = h @ wf + bf
        return jax.nn.log_softmax(logits, axis=1)

    ref = jax.vmap(reference_forward)(a_hat_b, x)

    assert out.shape == (batch, num_nodes, num_classes)
    assert bool(jnp.all(jnp.isfinite(out)))
    assert bool(jnp.allclose(jnp.sum(jnp.exp(out), axis=-1), 1.0, atol=1e-5))
    assert float(jnp.max(jnp.abs(out - ref))) < 1e-1

    print("KERNEL_OK")
</pallas_src>

<mosaic_0001>
module attributes {stable_mosaic.version = 11 : i64} {
  func.func @gcn_classifier_kernel(%arg0: i32, %arg1: memref<1x32x128xbf16, #tpu.memory_space<vmem>>, %arg2: memref<80x128xbf16, #tpu.memory_space<vmem>>, %arg3: memref<8x128xf32, #tpu.memory_space<vmem>>, %arg4: memref<1x16x128xf32, #tpu.memory_space<vmem>>) attributes {dimension_semantics = [#tpu.dimension_semantics<parallel>], iteration_bounds = array<i64: 4>, scalar_prefetch = 0 : i64, scratch_operands = 0 : i64, tpu.core_type = #tpu.core_type<tc>, window_params = [{transform_indices = @transform_0, window_bounds = array<i64: 1, 32, 128>}, {pipeline_mode = #tpu.pipeline_mode<synchronous>, transform_indices = @transform_1, window_bounds = array<i64: 80, 128>}, {pipeline_mode = #tpu.pipeline_mode<synchronous>, transform_indices = @transform_2, window_bounds = array<i64: 8, 128>}, {transform_indices = @transform_3, window_bounds = array<i64: 1, 16, 128>}]} {
    %c0 = arith.constant 0 : index
    %c0_0 = arith.constant 0 : index
    %c0_1 = arith.constant 0 : index
    %0 = vector.load %arg1[%c0, %c0_0, %c0_1] : memref<1x32x128xbf16, #tpu.memory_space<vmem>>, vector<1x32x128xbf16>
    %1 = vector.shape_cast %0 : vector<1x32x128xbf16> to vector<32x128xbf16>
    %2 = vector.extract_strided_slice %1 {offsets = [0, 0], sizes = [16, 16], strides = [1, 1]} : vector<32x128xbf16> to vector<16x16xbf16>
    %3 = vector.extract_strided_slice %1 {offsets = [16, 0], sizes = [16, 8], strides = [1, 1]} : vector<32x128xbf16> to vector<16x8xbf16>
    %c0_2 = arith.constant 0 : index
    %c0_3 = arith.constant 0 : index
    %4 = vector.load %arg2[%c0_2, %c0_3] : memref<80x128xbf16, #tpu.memory_space<vmem>>, vector<8x32xbf16>
    %c16 = arith.constant 16 : index
    %c0_4 = arith.constant 0 : index
    %5 = vector.load %arg2[%c16, %c0_4] : memref<80x128xbf16, #tpu.memory_space<vmem>>, vector<32x32xbf16>
    %c48 = arith.constant 48 : index
    %c0_5 = arith.constant 0 : index
    %6 = vector.load %arg2[%c48, %c0_5] : memref<80x128xbf16, #tpu.memory_space<vmem>>, vector<32x128xbf16>
    %c0_6 = arith.constant 0 : index
    %c0_7 = arith.constant 0 : index
    %7 = vector.load %arg3[%c0_6, %c0_7] : memref<8x128xf32, #tpu.memory_space<vmem>>, vector<8x128xf32>
    %8 = vector.extract_strided_slice %7 {offsets = [0, 0], sizes = [1, 32], strides = [1, 1]} : vector<8x128xf32> to vector<1x32xf32>
    %9 = vector.extract_strided_slice %7 {offsets = [1, 0], sizes = [1, 32], strides = [1, 1]} : vector<8x128xf32> to vector<1x32xf32>
    %10 = vector.extract_strided_slice %7 {offsets = [2, 0], sizes = [1, 128], strides = [1, 1]} : vector<8x128xf32> to vector<1x128xf32>
    %cst = arith.constant dense<0.000000e+00> : vector<16x8xf32>
    %11 = tpu.matmul %2, %3, %cst {dimension_numbers = #tpu.dot_dimension_numbers<[1], [0], [0], [1], [0, 0, 1, 1], [], []>} : vector<16x16xbf16>, vector<16x8xbf16>, vector<16x8xf32> -> vector<16x8xf32>
    %12 = arith.truncf %11 : vector<16x8xf32> to vector<16x8xbf16>
    %cst_8 = arith.constant dense<0.000000e+00> : vector<16x32xf32>
    %13 = tpu.matmul %12, %4, %cst_8 {dimension_numbers = #tpu.dot_dimension_numbers<[1], [0], [0], [1], [0, 0, 1, 1], [], []>} : vector<16x8xbf16>, vector<8x32xbf16>, vector<16x32xf32> -> vector<16x32xf32>
    %14 = vector.broadcast %8 : vector<1x32xf32> to vector<16x32xf32>
    %15 = arith.addf %13, %14 : vector<16x32xf32>
    %cst_9 = arith.constant 0.000000e+00 : f32
    %16 = vector.broadcast %cst_9 : f32 to vector<16x32xf32>
    %17 = arith.maximumf %15, %16 : vector<16x32xf32>
    %18 = arith.truncf %17 : vector<16x32xf32> to vector<16x32xbf16>
    %cst_10 = arith.constant dense<0.000000e+00> : vector<16x32xf32>
    %19 = tpu.matmul %18, %5, %cst_10 {dimension_numbers = #tpu.dot_dimension_numbers<[1], [0], [0], [1], [0, 0, 1, 1], [], []>} : vector<16x32xbf16>, vector<32x32xbf16>, vector<16x32xf32> -> vector<16x32xf32>
    %20 = arith.truncf %19 : vector<16x32xf32> to vector<16x32xbf16>
    %cst_11 = arith.constant dense<0.000000e+00> : vector<16x32xf32>
    %21 = tpu.matmul %2, %20, %cst_11 {dimension_numbers = #tpu.dot_dimension_numbers<[1], [0], [0], [1], [0, 0, 1, 1], [], []>} : vector<16x16xbf16>, vector<16x32xbf16>, vector<16x32xf32> -> vector<16x32xf32>
    %22 = vector.broadcast %9 : vector<1x32xf32> to vector<16x32xf32>
    %23 = arith.addf %21, %22 : vector<16x32xf32>
    %cst_12 = arith.constant 0.000000e+00 : f32
    %24 = vector.broadcast %cst_12 : f32 to vector<16x32xf32>
    %25 = arith.maximumf %23, %24 : vector<16x32xf32>
    %26 = arith.truncf %25 : vector<16x32xf32> to vector<16x32xbf16>
    %cst_13 = arith.constant dense<0.000000e+00> : vector<16x128xf32>
    %27 = tpu.matmul %26, %6, %cst_13 {dimension_numbers = #tpu.dot_dimension_numbers<[1], [0], [0], [1], [0, 0, 1, 1], [], []>} : vector<16x32xbf16>, vector<32x128xbf16>, vector<16x128xf32> -> vector<16x128xf32>
    %28 = vector.broadcast %10 : vector<1x128xf32> to vector<16x128xf32>
    %29 = arith.addf %27, %28 : vector<16x128xf32>
    %cst_14 = arith.constant dense<0xFF800000> : vector<16xf32>
    %30 = vector.multi_reduction <maximumf>, %29, %cst_14 [1] : vector<16x128xf32> to vector<16xf32>
    %31 = vector.shape_cast %30 : vector<16xf32> to vector<16x1xf32>
    %32 = vector.broadcast %31 : vector<16x1xf32> to vector<16x128xf32>
    %33 = arith.subf %29, %32 : vector<16x128xf32>
    %34 = math.exp %33 : vector<16x128xf32>
    %cst_15 = arith.constant dense<0.000000e+00> : vector<16xf32>
    %35 = vector.multi_reduction <add>, %34, %cst_15 [1] : vector<16x128xf32> to vector<16xf32>
    %36 = vector.shape_cast %35 : vector<16xf32> to vector<16x1xf32>
    %37 = math.log %36 : vector<16x1xf32>
    %38 = vector.broadcast %37 : vector<16x1xf32> to vector<16x128xf32>
    %39 = arith.subf %33, %38 : vector<16x128xf32>
    %c0_16 = arith.constant 0 : index
    %c0_17 = arith.constant 0 : index
    %c0_18 = arith.constant 0 : index
    %40 = vector.load %arg4[%c0_16, %c0_17, %c0_18] : memref<1x16x128xf32, #tpu.memory_space<vmem>>, vector<1x16x128xf32>
    %41 = vector.shape_cast %40 : vector<1x16x128xf32> to vector<16x128xf32>
    %42 = vector.shape_cast %39 : vector<16x128xf32> to vector<1x16x128xf32>
    tpu.vector_store %arg4[%c0_16, %c0_17, %c0_18], %42 {strides = array<i32>} : memref<1x16x128xf32, #tpu.memory_space<vmem>>, vector<1x16x128xf32>,
    return
  }
  func.func @transform_0(%arg0: i32) -> (i32, i32, i32) {
    %c0_i32 = arith.constant 0 : i32
    %c0_i32_0 = arith.constant 0 : i32
    %c0_i32_1 = arith.constant 0 : i32
    return %arg0, %c0_i32, %c0_i32_0 : i32, i32, i32
  }
  func.func @transform_1(%arg0: i32) -> (i32, i32) {
    %c0_i32 = arith.constant 0 : i32
    %c0_i32_0 = arith.constant 0 : i32
    %c0_i32_1 = arith.constant 0 : i32
    return %c0_i32, %c0_i32_0 : i32, i32
  }
  func.func @transform_2(%arg0: i32) -> (i32, i32) {
    %c0_i32 = arith.constant 0 : i32
    %c0_i32_0 = arith.constant 0 : i32
    %c0_i32_1 = arith.constant 0 : i32
    return %c0_i32, %c0_i32_0 : i32, i32
  }
  func.func @transform_3(%arg0: i32) -> (i32, i32, i32) {
    %c0_i32 = arith.constant 0 : i32
    %c0_i32_0 = arith.constant 0 : i32
    %c0_i32_1 = arith.constant 0 : i32
    return %arg0, %c0_i32, %c0_i32_0 : i32, i32, i32
  }
}

</mosaic_0001>

<bundles_post_ra>
// kernel: forward.1
= control target key start
LH: loop header
LB: loop body
LE: loop exit
PB: predicated region body
PF: predicated region fallthrough
CT: control target
= control target key end

     0   :  { %8 = vsyncpa [#allocation3], 0  ;;  %s1072_s0 = inlined_call_operand.hbm [shape: bf16[4,32,128], index: 0, kind: input, shape index: {}]   ;;  %s1073_s1 = inlined_call_operand.hbm [shape: bf16[80,128], index: 1, kind: input, shape index: {}]   ;;  %s1074_s2 = inlined_call_operand.hbm [shape: f32[8,128], index: 2, kind: input, shape index: {}]   ;;  %s1075_s3 = inlined_call_operand.vmem [shape: f32[4,16,128], index: 3, kind: output, shape index: {}]  }
   0x1   :  { %10 = vsyncpa [#allocation3 + $0x1], 0 }
   0x2   :  { %11 = vsyncpa [#allocation5], 0  ;;  %s920_s12 = smov 0   ;;  %s922_s13 = smov 0  }
   0x3   :  { %s924_s14 = smov 0   ;;  %s926_s15 = smov 0  }
   0x4 LB: > { %s939_s16 = sadd.s32 4294967295, %s891_s15   ;;  %p37_p0 = scmp.ne.s32.totalorder %s883_s13, %s879_s12  ;;  %s891_s15 = sphi %s926_s15, %s1090_s15   ;;  %s887_s14 = sphi %s924_s14, %s1089_s14   ;;  %s883_s13 = sphi %s922_s13, %s1088_s13   ;;  %s879_s12 = sphi %s920_s12, %s1087_s12  }
   0x5   : > { %p1076_p1 = scmp.eq.s32.totalorder %s939_s16, 0  ;;  %p621_p2 = scmp.ge.s32.totalorder %s891_s15, 1 }
   0x6   : > { %p116_p3 = scmp.lt.s32.totalorder %s891_s15, 5  ;;  %s893_s19 = smov [#allocation4]  }
   0x7   : > { %p947_p4 = por %p1076_p1, %p37_p0  ;;  %s128_s20 = sshll.u32 %s893_s19, 4  ;;  %s129_s20 = int_to_ptr.vmem [resolvable:$true] %s128_s20 }
   0x8   : > { %p951_p5 = pnand %p621_p2, %p116_p3  ;;  %s894_s22 = smov [#allocation6]  }
   0x9   : > { %s1079_s17 = scalar_select %p947_p4, 1, 0 }
   0xa   : > { %s1080_s18 = scalar_select %p951_p5, 1, 0 }
   0xb   : > { %p705_p6 = pneg %p951_p5  ;;  %s142_s23 = sshll.u32 %s894_s22, 4  ;;  %s143_s23 = int_to_ptr.vmem [resolvable:$true] %s142_s23 }
   0xc   : > { %s784_s24 = scalar_lea.vmem %s129_s20, 640  ;;  %p792_p12 = scmp.lt.s32.totalorder %s129_s20, %s129_s20 }
   0xd   : > { %p959_p7 = pnand %p705_p6, %p1076_p1  ;;  %p785_p9 = scmp.ne.s32.totalorder %s129_s20, %s784_s24 }
   0xe   : > { %p793_p13 = scmp.lt.s32.totalorder %s784_s24, %s784_s24 }
   0xf   : > { %p775_p8 = pneg %p959_p7 }
  0x10   : > { %p794_p0 = por %p793_p13, %p792_p12 }
  0x11   : > { %p787_p10 = pnand %p785_p9, %p775_p8 }
  0x13   : > { %p788_p11 = pneg %p787_p10 }
  0x15   : > { %p795_p2 = pnand %p794_p0, %p788_p11 }
  0x17   : > { %798 = shalt.err (!%p795_p2)
}
  0x18   : > { %s895_s25 = smov 64   ;;  %s896_s26 = smov 4  }
  0x19   : > { %708 = dma.hbm_to_vmem [thread:$0]  (!%p959_p7), %s1073_s1, 640, %s129_s20, [#allocation5], %s895_s25, %s895_s25, %s896_s26  }
  0x1a   : > { %s810_s29 = scalar_lea.vmem %s143_s23, 128  ;;  %p818_p10 = scmp.lt.s32.totalorder %s143_s23, %s143_s23 }
  0x1b   : > { %p811_p3 = scmp.ne.s32.totalorder %s143_s23, %s810_s29  ;;  %p819_p11 = scmp.lt.s32.totalorder %s810_s29, %s810_s29 }
  0x1d   : > { %p813_p6 = pnand %p811_p3, %p775_p8  ;;  %p820_p12 = por %p819_p11, %p818_p10 }
  0x1f   : > { %p814_p9 = pneg %p813_p6 }
  0x21   : > { %p821_p13 = pnand %p820_p12, %p814_p9 }
  0x23   : > { %824 = shalt.err (!%p821_p13)
}
  0x24   : > { %711 = dma.hbm_to_vmem [thread:$0]  (!%p959_p7), %s1074_s2, 128, %s143_s23, [#allocation5]  }
  0x25   : > { %s985_s5 = sadd.s32 1, %s891_s15   ;;  %s24_s6 = sadd.s32 1, %s887_s14 }
  0x26   : > { %s21_s7 = ssub.s32 %s891_s15, %s985_s5  ;;  %p31_p8 = scmp.ne.s32.totalorder %s887_s14, %s883_s13 }
  0x27   : > { %p22_p0 = scmp.eq.s32.totalorder %s21_s7, 0  ;;  %p32_p2 = scmp.eq.s32.totalorder %s891_s15, 0 }
  0x28   : > { %p718_p3 = scmp.lt.s32.totalorder %s891_s15, 4  ;;  %s153_s8 = sand.u32 1, %s887_s14  }
  0x29   : > { %s996_s9 = scalar_select %p22_p0, %s887_s14, %s24_s6  }
  0x2a   : > { %p33_p6 = por %p32_p2, %p31_p8  ;;  %s625_s10 = sshll.u32 %s153_s8, 4 }
  0x2b   : > { %s647_s11 = sshll.u32 %s891_s15, 8  ;;  %s157_s21 = scalar_lea.vmem [#allocation2], %s625_s10 }
  0x2c   : > { %s1002_s20 = scalar_lea.hbm %s1072_s0, %s647_s11  ;;  %s164_s22 = sshll.u32 %s157_s21, 4  ;;  %s1008_s22 = int_to_ptr.vmem [resolvable:$true] %s164_s22 }
  0x2d   : > { %p1004_p7 = pnand %p718_p3, %p33_p6  ;;  %s1010_s24 = scalar_lea.sflag [#allocation3], %s153_s8 }
  0x2e   : > { %s825_s15 = scalar_lea.hbm %s1002_s20, 256  ;;  %s830_s29 = scalar_lea.hbm %s1072_s0, 1024 }
  0x2f   : > { %p826_p9 = scmp.ne.s32.totalorder %s1002_s20, %s825_s15  ;;  %p827_p10 = pneg %p1004_p7 }
  0x30   : > { %p831_p13 = scmp.lt.s32.totalorder %s1002_s20, %s1072_s0  ;;  %p832_p8 = scmp.lt.s32.totalorder %s830_s29, %s825_s15 }
  0x31   : > { %p828_p11 = pnand %p827_p10, %p826_p9 }
  0x32   : > { %p833_p0 = por %p832_p8, %p831_p13 }
  0x33   : > { %p829_p12 = pneg %p828_p11 }
  0x35   : > { %p834_p2 = pnand %p833_p0, %p829_p12 }
  0x37   : > { %837 = shalt.err (!%p834_p2)
}
  0x38   : > { %s838_s6 = scalar_lea.vmem %s1008_s22, 256  ;;  %s897_s7 = smov [#allocation2]  }
  0x39   : > { %p839_p3 = scmp.ne.s32.totalorder %s1008_s22, %s838_s6  ;;  %s843_s8 = sshll.u32 %s897_s7, 4  ;;  %s844_s8 = int_to_ptr.vmem [resolvable:$false] %s843_s8 }
  0x3a   : > { %s845_s10 = scalar_lea.vmem %s844_s8, 512  ;;  %p846_p11 = scmp.lt.s32.totalorder %s1008_s22, %s844_s8 }
  0x3b   : > { %p841_p6 = pnand %p839_p3, %p827_p10  ;;  %p847_p1 = scmp.lt.s32.totalorder %s845_s10, %s838_s6 }
  0x3d   : > { %p842_p9 = pneg %p841_p6  ;;  %p848_p4 = por %p847_p1, %p846_p11 }
  0x3f   : > { %p849_p5 = pnand %p848_p4, %p842_p9 }
  0x41   : > { %852 = shalt.err (!%p849_p5)
}
  0x42   : > { %715 = dma.hbm_to_vmem [thread:$0]  (!%p1004_p7), %s1002_s20, 256, %s1008_s22, %s1010_s24, %s895_s25, %s895_s25, %s896_s26  }
  0x43   : > { %p1083_p10 = scmp.ne.s32.totalorder %s1080_s18, 0 }
  0x44   : > { %s178_s11 = sand.u32 (!%p1083_p10), 1, %s883_s13   ;;  %p1084_p1 = scmp.ne.s32.totalorder (!%p1083_p10), %s1079_s17, 0 }
  0x45   : > { %176 = sbr.rel (%p1083_p10) target bundleno = 1403 (0x57b), region = 32  ;;  %s629_s12 = sshll.u32 (!%p1083_p10), %s178_s11, 4 }
  0x46   : > { %s179_s19 = scalar_lea.sflag (!%p1083_p10), [#allocation3], %s178_s11  ;;  %s182_s21 = scalar_lea.vmem (!%p1083_p10), [#allocation2], %s629_s12 }
  0x4a   : > { %870 = dma.done.wait (%p1084_p1), %s179_s19, 256  }
  0x4b   : > { %872 = vsyncadd (%p1084_p1), %s179_s19, 4294967040  ;;  %p1085_p4 = scmp.eq.s32.totalorder %s939_s16, 0 }
  0x4d   : > { %874 = dma.done.wait (%p1085_p4), [#allocation5], 768   ;;  %p1086_p5 = pmov %p1085_p4 }
  0x4e   : > { %v898_v0 = vmov 0.0   ;;  %vm899_vm0 = vmmov 0   ;;  %v759_v1 = vld [vmem:[%s182_s21 + $0x8] sm:$0xff]   ;;  %v760_v2 = vld [vmem:[%s182_s21] sm:$0xff]   ;;  %vm244_vm1 = vcmask 130048   ;;  %vm298_vm2 = vcmask 1043456  }
  0x4f   : > { %876 = vsyncadd (%p1086_p5), [#allocation5], 4294966528  ;;  %661 = vmatprep.subr.bf16.mxu0 %v898_v0  ;;  %663 = vmatprep.mubr.msk.bf16.mxu0 %vm899_vm0, %v898_v0  ;;  %v223_v3 = vld [vmem:[#allocation4] sm:$0xf]  ;;  %vm294_vm3 = vcmask 64512   ;;  %v761_v10 = vld [vmem:[#allocation4 + $0x10] sm:$0xff]   ;;  %v290_v12 = vlaneseq }
  0x50   : > { %667 = vmatprep.subr.bf16.mxu1 %v898_v0  ;;  %669 = vmatprep.mubr.msk.bf16.mxu1 %vm899_vm0, %v898_v0  ;;  %v300_v4 = vsel %vm298_vm2, %v223_v3, 0  ;;  %v762_v11 = vld [vmem:[#allocation4 + $0x8] sm:$0xff]   ;;  %vm358_vm4 = vcmask 261120   ;;  %v763_v31 = vld [vmem:[#allocation4 + $0x20] sm:$0xff]   ;;  %v764_v32 = vld [vmem:[#allocation4 + $0x18] sm:$0xff]   ;;  %p213_p7 = scmp.lt.s32.totalorder %s939_s16, 3 }
  0x51   : > { %662 = vmatpush3.bf16.msra.mxu0 %v759_v1  ;;  %668 = vmatpush3.bf16.msra.mxu1 %v300_v4  ;;  %v291_v13 = vshrl.u32 %v290_v12, 7  ;;  %v232_v15 = vld [vmem:[#allocation6] sm:$0xff] }
  0x52   : > { %673 = vmatprep.subr.bf16.mxu0 %v898_v0  ;;  %681 = vmatprep.subr.bf16.mxu1 %v898_v0  ;;  %s1092_s16 = smov (!%p213_p7, %s939_s16), 3 }
  0x53   : > { %v292_v14 = vsub.s32 0, %v291_v13  ;;  %v406_v33 = vsub.s32 1, %v291_v13  ;;  %v454_v44 = vsub.s32 2, %v291_v13  ;;  %s648_s17 = sshll.u32 %s1092_s16, 4 }
  0x54   : > { %664 = vmatmul.mubr.msk.bf16.vlgmr.msra.gmra.mxu0 %vm244_vm1, %v760_v2  ;;  %s217_s26 = scalar_lea.vmem %s1075_s3, %s648_s17 }
  0x55   : > { %677 = vmatprep.mubr.msk.bf16.mxu0 %vm899_vm0, %v898_v0  ;;  %674 = vmatpush3.bf16.msra.mxu0 %v761_v10  ;;  %v293_v16 = vrot.slane %v232_v15, %v292_v14  ;;  %v407_v34 = vrot.slane %v232_v15, %v406_v33  ;;  %v455_v45 = vrot.slane %v232_v15, %v454_v44 }
  0x56   : > { %675 = vmatprep.subr.bf16.mxu0 %v898_v0 }
  0x59   : > { %676 = vmatpush3.bf16.msra.mxu0 %v762_v11 }
  0x5a   : > { %687 = vmatprep.subr.bf16.mxu0 %v898_v0 }
 0x114   : > { %v282_v5 = vpop.f32.mrf.mxu0 }
 0x116   : > { %v665_v6 = vpop.f32.mrf.mxu0 }
 0x118   : > { %v285_v7 = vpop.f32.mrf.mxu0 }
 0x119   : > { %v289_v8 = vpack.c.bf16 %v285_v7, %v282_v5 }
 0x11a   : > { %v666_v9 = vpop.f32.mrf.mxu0 }
 0x11b   : > { %670 = vmatmul.mubr.msk.bf16.vlgmr.msra.gmra.mxu1 %vm294_vm3, %v289_v8 }
 0x11c   : > { %683 = vmatprep.mubr.msk.bf16.mxu1 %vm899_vm0, %v898_v0 }
 0x1db   : > { %v336_v17 = vpop.f32.mrf.mxu1 }
 0x1dc   : > { %v337_v19 = vadd.f32 %v336_v17, %v293_v16 }
 0x1dd   : > { %v671_v18 = vpop.f32.mrf.mxu1 }
 0x1de   : > { %v343_v23 = vmax.f32 %v337_v19, 0.0 }
 0x1df   : > { %v339_v20 = vpop.f32.mrf.mxu1 }
 0x1e0   : > { %v340_v21 = vadd.f32 %v339_v20, %v293_v16 }
 0x1e1   : > { %v672_v22 = vpop.f32.mrf.mxu1 }
 0x1e2   : > { %v344_v24 = vmax.f32 %v340_v21, 0.0 }
 0x1e4   : > { %v345_v25 = vpack.c.bf16 %v344_v24, %v343_v23 }
 0x1e6   : > { %678 = vmatmul.mubr.msk.bf16.vlgmr.msra.gmra.mxu0 %vm358_vm4, %v345_v25 }
 0x1e7   : > { %691 = vmatprep.mubr.msk.bf16.mxu0 %vm899_vm0, %v898_v0  ;;  %688 = vmatpush3.bf16.msra.mxu0 %v763_v31 }
 0x1e8   : > { %689 = vmatprep.subr.bf16.mxu0 %v898_v0 }
 0x1eb   : > { %690 = vmatpush3.bf16.msra.mxu0 %v764_v32 }
 0x2a6   : > { %v396_v26 = vpop.f32.mrf.mxu0 }
 0x2a8   : > { %v679_v27 = vpop.f32.mrf.mxu0 }
 0x2aa   : > { %v399_v28 = vpop.f32.mrf.mxu0 }
 0x2ab   : > { %v403_v29 = vpack.c.bf16 %v399_v28, %v396_v26 }
 0x2ac   : > { %v680_v30 = vpop.f32.mrf.mxu0 }
 0x2ad   : > { %682 = vmatpush3.bf16.msra.mxu1 %v403_v29 }
 0x2b0   : > { %684 = vmatmul.mubr.msk.bf16.vlgmr.msra.gmra.mxu1 %vm244_vm1, %v760_v2 }
 0x370   : > { %v442_v35 = vpop.f32.mrf.mxu1 }
 0x371   : > { %v443_v37 = vadd.f32 %v442_v35, %v407_v34 }
 0x372   : > { %v685_v36 = vpop.f32.mrf.mxu1 }
 0x373   : > { %v449_v41 = vmax.f32 %v443_v37, 0.0 }
 0x374   : > { %v445_v38 = vpop.f32.mrf.mxu1 }
 0x375   : > { %v446_v39 = vadd.f32 %v445_v38, %v407_v34 }
 0x376   : > { %v686_v40 = vpop.f32.mrf.mxu1 }
 0x377   : > { %v450_v42 = vmax.f32 %v446_v39, 0.0 }
 0x379   : > { %v451_v43 = vpack.c.bf16 %v450_v42, %v449_v41 }
 0x37b   : > { %692 = vmatmul.mubr.msk.bf16.vlgmr.msra.gmra.mxu0 %vm358_vm4, %v451_v43 }
 0x43b   : > { %v505_v46 = vpop.f32.mrf.mxu0 }
 0x43c   : > { %v506_v47 = vadd.f32 %v505_v46, %v455_v45 }
 0x43d   : > { %v693_v48 = vpop.f32.mrf.mxu0 }
 0x43e   : > { %512 = vmax.xlane.f32.xlu0 %v506_v47 }
 0x43f   : > { %v508_v49 = vpop.f32.mrf.mxu0 }
 0x440   : > { %v509_v50 = vadd.f32 %v508_v49, %v455_v45 }
 0x441   : > { %v694_v51 = vpop.f32.mrf.mxu0 }
 0x442   : > { %514 = vmax.xlane.f32.xlu0 %v509_v50 }
 0x4c7   : > { %v513_v52 = vpop.xlane.xlu0 %512 }
 0x4c8   : > { %v516_v53 = vsub.f32 %v506_v47, %v513_v52 }
 0x4ca   : > { %v518_v54 = vmul.f32 1.442695, %v516_v53 }
 0x4cb   : > { %v515_v55 = vpop.xlane.xlu0 %514 }
 0x4cc   : > { %v517_v56 = vsub.f32 %v509_v50, %v515_v55  ;;  %765 = vpow2.f32 %v518_v54 }
 0x4ce   : > { %v520_v57 = vmul.f32 1.442695, %v517_v56 }
 0x4d0   : > { %767 = vpow2.f32 %v520_v57 }
 0x4d9   : > { %v766_v58 = vpop.eup %765 }
 0x4da   : > { %522 = vadd.xlane.f32.xlu1 %v766_v58 }
 0x4dd   : > { %v768_v59 = vpop.eup %767 }
 0x4de   : > { %524 = vadd.xlane.f32.xlu1 %v768_v59 }
 0x563   : > { %v523_v60 = vpop.xlane.xlu1 %522 }
 0x564   : > { %769 = vlog2.f32 %v523_v60 }
 0x567   : > { %v525_v61 = vpop.xlane.xlu1 %524 }
 0x568   : > { %771 = vlog2.f32 %v525_v61 }
 0x571   : > { %v770_v62 = vpop.eup %769 }
 0x572   : > { %v527_v63 = vmul.f32 0.6931472, %v770_v62 }
 0x574   : > { %v530_v0 = vsub.f32 %v516_v53, %v527_v63 }
 0x575   : > { %v772_v1 = vpop.eup %771 }
 0x576   : > { %532 = vst [vmem:[%s217_s26] sm:$0xff] %v530_v0  ;;  %v529_v2 = vmul.f32 0.6931472, %v772_v1 }
 0x578   : > { %v531_v3 = vsub.f32 %v517_v56, %v529_v2 }
 0x57a   : > { %533 = vst [vmem:[%s217_s26 + $0x8] sm:$0xff] %v531_v3 }
 0x57b PF: > { %p14_p12 = scmp.ge.s32.totalorder %s985_s5, 6   ;;  %s1087_s12 = smov %s883_s13 }
 0x57c   : > { %s1088_s13 = smov %s887_s14  ;;  %s1089_s14 = smov %s996_s9 }
 0x57d   : > { %s1090_s15 = smov %s985_s5  ;;  %16 = sbr.rel (!%p14_p12) target bundleno = 4 (0x4), region = 80 }
 0x582   :  { %555 = vsyncpa [#allocation3], 1 }
 0x583   :  { %557 = vsyncpa [#allocation3 + $0x1], 1 }
 0x584   :  { %558 = vsyncpa [#allocation5], 1 }

</bundles_post_ra>
